<compile_context>
chip_gen: v7x
topology: tpu7x:2x2x1
jax: 0.10.0
libtpu: 0.0.40
codegen_flags: <defaults>
</compile_context>

<pallas_src>
import math

import jax
import jax.numpy as jnp
from jax.experimental import pallas as pl
from jax.experimental.pallas import tpu as pltpu


def _prenorm_kernel(x_ref, scale_ref, bias_ref, o_ref):
    # x_ref:     (tile_rows, W)  lane-dense tile of the input
    # scale_ref: (1, W) float32  (scale tiled to W lanes)
    # bias_ref:  (1, W) float32  (shift * scale tiled to W lanes)
    x = x_ref[...].astype(jnp.float32)
    o_ref[...] = (x * scale_ref[...] + bias_ref[...]).astype(o_ref.dtype)


def prenorm_layer(x, shift, scale, *, target_block_bytes=2 * 1024 * 1024):
    """Pallas implementation of PreNormLayer.forward (inference path).

    x:      (..., n_units)   any leading shape
    shift:  (n_units,)       float32 buffer
    scale:  (n_units,)       float32 buffer
    Returns an array of the same shape/dtype as x.
    """
    orig_shape = x.shape
    d = orig_shape[-1]
    total = x.size

    # Lane-dense width: multiple of 128 (full vreg lanes) AND of n_units
    # (so shift/scale can be tiled along lanes).  Grow to ~512 lanes.
    w = (d * 128) // math.gcd(d, 128)  # lcm(d, 128)
    if w < 512:
        w *= 512 // w

    # Rows of the lane-dense (rows2, w) view of the flattened input.
    rows2 = -(-total // w)

    # Pick tile_rows so one block is ~target_block_bytes (multiple of 8
    # sublanes), but never bigger than the (padded-to-8) row count.
    bytes_per_row = w * x.dtype.itemsize
    tile_rows = max(8, min(2048, target_block_bytes // bytes_per_row))
    tile_rows = (int(tile_rows) // 8) * 8
    tile_rows = min(tile_rows, (-(-rows2 // 8)) * 8)

    # Pad the flat array so the grid divides evenly (no edge masking needed).
    rows_p = (-(-rows2 // tile_rows)) * tile_rows
    flat = x.reshape(-1)
    pad = rows_p * w - total
    if pad:
        flat = jnp.pad(flat, (0, pad))
    x2 = flat.reshape(rows_p, w)

    # Tile shift/scale to the lane-dense width; keep them float32 and fold
    # (x + shift) * scale  ->  x * scale + (shift * scale).
    reps = w // d
    scale_f32 = scale.astype(jnp.float32)
    shift_f32 = shift.astype(jnp.float32)
    scale_w = jnp.tile(scale_f32, reps).reshape(1, w)
    bias_w = jnp.tile(shift_f32 * scale_f32, reps).reshape(1, w)

    grid = (rows_p // tile_rows,)

    out2 = pl.pallas_call(
        _prenorm_kernel,
        out_shape=jax.ShapeDtypeStruct((rows_p, w), x.dtype),
        grid_spec=pltpu.PrefetchScalarGridSpec(
            num_scalar_prefetch=0,
            grid=grid,
            in_specs=[
                pl.BlockSpec((tile_rows, w), lambda i: (i, 0)),
                pl.BlockSpec((1, w), lambda i: (0, 0)),
                pl.BlockSpec((1, w), lambda i: (0, 0)),
            ],
            out_specs=pl.BlockSpec((tile_rows, w), lambda i: (i, 0)),
        ),
        compiler_params=pltpu.CompilerParams(
            dimension_semantics=("parallel",),
            vmem_limit_bytes=32 * 1024 * 1024,
        ),
    )(x2, scale_w, bias_w)

    out_flat = out2.reshape(-1)
    if pad:
        out_flat = out_flat[:total]
    return out_flat.reshape(orig_shape)


if __name__ == "__main__":
    key = jax.random.PRNGKey(0)
    k_x, k_shift, k_scale, k_x2 = jax.random.split(key, 4)

    n_units = 32          # PreNormLayer(n_units=32)
    rows = 256            # e.g. 256 graph nodes / flattened batch

    x = jax.random.normal(k_x, (rows, n_units), dtype=jnp.float32)

    # __init__ sets shift=zeros(n_units), scale=ones(n_units); we perturb them
    # deterministically (as stop_updates() would) so the broadcast is exercised.
    shift = jnp.zeros((n_units,), jnp.float32) + 0.1 * jax.random.normal(
        k_shift, (n_units,), dtype=jnp.float32)
    scale = jnp.ones((n_units,), jnp.float32) + 0.1 * jax.random.normal(
        k_scale, (n_units,), dtype=jnp.float32)

    out = jax.block_until_ready(prenorm_layer(x, shift, scale))

    # Pure-JAX reference of the PyTorch forward: (x + shift) * scale
    ref = (x + shift[None, :]) * scale[None, :]
    assert out.shape == x.shape and out.dtype == x.dtype
    assert jnp.allclose(out, ref, atol=1e-5, rtol=1e-5)

    # Second case: multi-dim leading shape with a row count that does NOT
    # divide the lane-dense width (exercises the padding/slicing path).
    x_b = jax.random.normal(k_x2, (7, 19, n_units), dtype=jnp.float32)
    out_b = jax.block_until_ready(prenorm_layer(x_b, shift, scale))
    ref_b = (x_b + shift) * scale
    assert out_b.shape == x_b.shape and out_b.dtype == x_b.dtype
    assert jnp.allclose(out_b, ref_b, atol=1e-5, rtol=1e-5)

    # TODO(synk): the stats-gathering path (start_updates/update_stats/
    # stop_updates/PreNormException) is training-time host logic (online
    # mean/var accumulation across calls), not part of the forward hot path,
    # so it is not implemented as a kernel.

    print("KERNEL_OK")
</pallas_src>

<mosaic_0001>
module attributes {stable_mosaic.version = 11 : i64} {
  func.func @_prenorm_kernel(%arg0: i32, %arg1: memref<16x512xf32, #tpu.memory_space<vmem>>, %arg2: memref<1x512xf32, #tpu.memory_space<vmem>>, %arg3: memref<1x512xf32, #tpu.memory_space<vmem>>, %arg4: memref<16x512xf32, #tpu.memory_space<vmem>>) attributes {dimension_semantics = [#tpu.dimension_semantics<parallel>], iteration_bounds = array<i64: 1>, scalar_prefetch = 0 : i64, scratch_operands = 0 : i64, tpu.core_type = #tpu.core_type<tc>, window_params = [{transform_indices = @transform_0, window_bounds = array<i64: 16, 512>}, {pipeline_mode = #tpu.pipeline_mode<synchronous>, transform_indices = @transform_1, window_bounds = array<i64: 1, 512>}, {pipeline_mode = #tpu.pipeline_mode<synchronous>, transform_indices = @transform_2, window_bounds = array<i64: 1, 512>}, {transform_indices = @transform_3, window_bounds = array<i64: 16, 512>}]} {
    %c0 = arith.constant 0 : index
    %c0_0 = arith.constant 0 : index
    %0 = vector.load %arg1[%c0, %c0_0] : memref<16x512xf32, #tpu.memory_space<vmem>>, vector<16x512xf32>
    %c0_1 = arith.constant 0 : index
    %c0_2 = arith.constant 0 : index
    %1 = vector.load %arg2[%c0_1, %c0_2] : memref<1x512xf32, #tpu.memory_space<vmem>>, vector<1x512xf32>
    %2 = vector.broadcast %1 : vector<1x512xf32> to vector<16x512xf32>
    %3 = arith.mulf %0, %2 : vector<16x512xf32>
    %c0_3 = arith.constant 0 : index
    %c0_4 = arith.constant 0 : index
    %4 = vector.load %arg3[%c0_3, %c0_4] : memref<1x512xf32, #tpu.memory_space<vmem>>, vector<1x512xf32>
    %5 = vector.broadcast %4 : vector<1x512xf32> to vector<16x512xf32>
    %6 = arith.addf %3, %5 : vector<16x512xf32>
    %c0_5 = arith.constant 0 : index
    %c0_6 = arith.constant 0 : index
    %7 = vector.load %arg4[%c0_5, %c0_6] : memref<16x512xf32, #tpu.memory_space<vmem>>, vector<16x512xf32>
    tpu.vector_store %arg4[%c0_5, %c0_6], %6 {strides = array<i32>} : memref<16x512xf32, #tpu.memory_space<vmem>>, vector<16x512xf32>,
    return
  }
  func.func @transform_0(%arg0: i32) -> (i32, i32) {
    %c0_i32 = arith.constant 0 : i32
    %c0_i32_0 = arith.constant 0 : i32
    return %arg0, %c0_i32 : i32, i32
  }
  func.func @transform_1(%arg0: i32) -> (i32, i32) {
    %c0_i32 = arith.constant 0 : i32
    %c0_i32_0 = arith.constant 0 : i32
    %c0_i32_1 = arith.constant 0 : i32
    return %c0_i32, %c0_i32_0 : i32, i32
  }
  func.func @transform_2(%arg0: i32) -> (i32, i32) {
    %c0_i32 = arith.constant 0 : i32
    %c0_i32_0 = arith.constant 0 : i32
    %c0_i32_1 = arith.constant 0 : i32
    return %c0_i32, %c0_i32_0 : i32, i32
  }
  func.func @transform_3(%arg0: i32) -> (i32, i32) {
    %c0_i32 = arith.constant 0 : i32
    %c0_i32_0 = arith.constant 0 : i32
    return %arg0, %c0_i32 : i32, i32
  }
}

</mosaic_0001>

<bundles_post_ra>
// kernel: tpu_custom_call.1
= control target key start
LH: loop header
LB: loop body
LE: loop exit
PB: predicated region body
PF: predicated region fallthrough
CT: control target
= control target key end

     0   :  { %8 = vsyncpa [#allocation3], 0  ;;  %s282_s0 = inlined_call_operand.hbm [shape: f32[16,512], index: 0, kind: input, shape index: {}]   ;;  %s283_s1 = inlined_call_operand.hbm [shape: f32[1,512], index: 1, kind: input, shape index: {}]   ;;  %s284_s2 = inlined_call_operand.vmem [shape: f32[1,512], index: 2, kind: input, shape index: {}]   ;;  %s285_s3 = inlined_call_operand.hbm [shape: f32[16,512], index: 3, kind: output, shape index: {}]  }
   0x1   :  { %9 = vsyncpa [#allocation6], 0 }
   0x2   :  { %10 = vsyncpa [#allocation4], 0  ;;  %s212_s12 = smov [#allocation2]   ;;  %s140_s16 = scalar_lea.hbm %s282_s0, 1024 }
   0x3   :  { %s16_s13 = sshll.u32 %s212_s12, 4  ;;  %p141_p0 = scmp.ne.s32.totalorder %s282_s0, %s140_s16  ;;  %s17_s13 = int_to_ptr.vmem [resolvable:$true] %s16_s13 }
   0x4   :  { %p144_p1 = scmp.lt.u32.totalorder %s140_s16, %s282_s0 }
   0x6   :  { %p146_p2 = pnand %p144_p1, %p141_p0 }
   0x8   :  { %149 = shalt.err (!%p146_p2)
}
   0x9   :  { %s150_s21 = scalar_lea.vmem %s17_s13, 1024  ;;  %p155_p4 = scmp.lt.s32.totalorder %s17_s13, %s17_s13 }
   0xa   :  { %p151_p3 = scmp.ne.s32.totalorder %s17_s13, %s150_s21  ;;  %p156_p5 = scmp.lt.s32.totalorder %s150_s21, %s150_s21 }
   0xc   :  { %p157_p6 = por %p156_p5, %p155_p4 }
   0xe   :  { %p158_p7 = pnand %p157_p6, %p151_p3 }
  0x10   :  { %161 = shalt.err (!%p158_p7)
}
  0x11   :  { %s213_s22 = smov 512   ;;  %s214_s23 = smov 32  }
  0x12   :  { %22 = dma.hbm_to_vmem [thread:$0]  %s282_s0, 1024, %s17_s13, [#allocation3], %s213_s22, %s213_s22, %s214_s23  }
  0x13   :  { %s215_s26 = smov [#allocation5]   ;;  %s162_s30 = scalar_lea.hbm %s283_s1, 64 }
  0x14   :  { %s29_s27 = sshll.u32 %s215_s26, 4  ;;  %p163_p8 = scmp.ne.s32.totalorder %s283_s1, %s162_s30  ;;  %s30_s27 = int_to_ptr.vmem [resolvable:$true] %s29_s27 }
  0x15   :  { %p166_p9 = scmp.lt.u32.totalorder %s162_s30, %s283_s1 }
  0x17   :  { %p168_p10 = pnand %p166_p9, %p163_p8 }
  0x19   :  { %171 = shalt.err (!%p168_p10)
}
  0x1a   :  { %s172_s8 = scalar_lea.vmem %s30_s27, 64  ;;  %p177_p12 = scmp.lt.s32.totalorder %s30_s27, %s30_s27 }
  0x1b   :  { %p173_p11 = scmp.ne.s32.totalorder %s30_s27, %s172_s8  ;;  %p178_p13 = scmp.lt.s32.totalorder %s172_s8, %s172_s8 }
  0x1d   :  { %p179_p0 = por %p178_p13, %p177_p12 }
  0x1f   :  { %p180_p1 = pnand %p179_p0, %p173_p11 }
  0x21   :  { %183 = shalt.err (!%p180_p1)
}
  0x22   :  { %32 = dma.hbm_to_vmem [thread:$0]  %s283_s1, 64, %s30_s27, [#allocation6]  }
  0x23   :  { %206 = dma.done.wait [#allocation3], 1024  }
  0x24   :  { %207 = vsyncadd [#allocation3], 4294966272 }
  0x25   :  { %208 = dma.done.wait [#allocation6], 64  }
  0x26   :  { %209 = vsyncadd [#allocation6], 4294967232  ;;  %v51_v0 = vlaneseq  ;;  %v41_v6 = vld [vmem:[#allocation2] sm:$0xff]  ;;  %v42_v11 = vld [vmem:[#allocation2 + $0x8] sm:$0xff]  ;;  %s216_s1 = smov [#allocation7]  }
  0x27   :  { %v49_v7 = vld [vmem:[#allocation5] sm:$0xf]  ;;  %v43_v14 = vld [vmem:[#allocation2 + $0x10] sm:$0xff]  ;;  %v44_v15 = vld [vmem:[#allocation2 + $0x18] sm:$0xff] }
  0x28   :  { %v52_v1 = vshrl.u32 %v51_v0, 7  ;;  %v79_v8 = vld [vmem:[%s284_s2] sm:$0xf]  ;;  %v46_v21 = vld [vmem:[#allocation2 + $0x28] sm:$0xff]  ;;  %v47_v22 = vld [vmem:[#allocation2 + $0x30] sm:$0xff]  ;;  %s122_s2 = sshll.u32 %s216_s1, 4  ;;  %s123_s2 = int_to_ptr.vmem [resolvable:$true] %s122_s2 }
  0x29   :  { %v45_v20 = vld [vmem:[#allocation2 + $0x20] sm:$0xff]  ;;  %v48_v27 = vld [vmem:[#allocation2 + $0x38] sm:$0xff]  ;;  %s184_s12 = scalar_lea.vmem %s123_s2, 1024  ;;  %p189_p3 = scmp.lt.s32.totalorder %s123_s2, %s123_s2 }
  0x2a   :  { %v53_v2 = vsub.s32 0, %v52_v1  ;;  %v57_v3 = vsub.s32 1, %v52_v1  ;;  %v61_v4 = vsub.s32 2, %v52_v1  ;;  %v65_v5 = vsub.s32 3, %v52_v1  ;;  %p185_p2 = scmp.ne.s32.totalorder %s123_s2, %s184_s12  ;;  %p190_p4 = scmp.lt.s32.totalorder %s184_s12, %s184_s12 }
  0x2c   :  { %v54_v9 = vrot.slane %v49_v7, %v53_v2  ;;  %v84_v10 = vrot.slane %v79_v8, %v53_v2  ;;  %v58_v12 = vrot.slane %v49_v7, %v57_v3  ;;  %v88_v13 = vrot.slane %v79_v8, %v57_v3  ;;  %p191_p5 = por %p190_p4, %p189_p3 }
  0x2d   :  { %v62_v16 = vrot.slane %v49_v7, %v61_v4  ;;  %v92_v17 = vrot.slane %v79_v8, %v61_v4  ;;  %v66_v18 = vrot.slane %v49_v7, %v65_v5  ;;  %v96_v19 = vrot.slane %v79_v8, %v65_v5 }
  0x2e   :  { %v71_v23 = vmul.f32 %v54_v9, %v41_v6  ;;  %v72_v24 = vmul.f32 %v58_v12, %v42_v11  ;;  %v75_v25 = vmul.f32 %v54_v9, %v45_v20  ;;  %v76_v26 = vmul.f32 %v58_v12, %v46_v21  ;;  %p192_p6 = pnand %p191_p5, %p185_p2 }
  0x2f   :  { %v73_v28 = vmul.f32 %v62_v16, %v43_v14  ;;  %v74_v29 = vmul.f32 %v66_v18, %v44_v15  ;;  %v77_v30 = vmul.f32 %v62_v16, %v47_v22  ;;  %v78_v31 = vmul.f32 %v66_v18, %v48_v27 }
  0x30   :  { %v101_v32 = vadd.f32 %v84_v10, %v71_v23  ;;  %v102_v33 = vadd.f32 %v88_v13, %v72_v24  ;;  %v105_v34 = vadd.f32 %v84_v10, %v75_v25  ;;  %v106_v35 = vadd.f32 %v88_v13, %v76_v26 }
  0x31   :  { %v103_v36 = vadd.f32 %v92_v17, %v73_v28  ;;  %v104_v37 = vadd.f32 %v96_v19, %v74_v29  ;;  %v107_v38 = vadd.f32 %v92_v17, %v77_v30  ;;  %v108_v39 = vadd.f32 %v96_v19, %v78_v31 }
  0x32   :  { %109 = vst [vmem:[#allocation7] sm:$0xff] %v101_v32  ;;  %110 = vst [vmem:[#allocation7 + $0x8] sm:$0xff] %v102_v33 }
  0x33   :  { %113 = vst [vmem:[#allocation7 + $0x20] sm:$0xff] %v105_v34  ;;  %114 = vst [vmem:[#allocation7 + $0x28] sm:$0xff] %v106_v35 }
  0x34   :  { %111 = vst [vmem:[#allocation7 + $0x10] sm:$0xff] %v103_v36  ;;  %112 = vst [vmem:[#allocation7 + $0x18] sm:$0xff] %v104_v37 }
  0x35   :  { %115 = vst [vmem:[#allocation7 + $0x30] sm:$0xff] %v107_v38  ;;  %116 = vst [vmem:[#allocation7 + $0x38] sm:$0xff] %v108_v39 }
  0x36   :  { %195 = shalt.err (!%p192_p6)
}
  0x37   :  { %s196_s15 = scalar_lea.hbm %s285_s3, 1024 }
  0x38   :  { %p197_p7 = scmp.ne.s32.totalorder %s285_s3, %s196_s15  ;;  %p200_p8 = scmp.lt.u32.totalorder %s196_s15, %s285_s3 }
  0x3a   :  { %p202_p9 = pnand %p200_p8, %p197_p7 }
  0x3c   :  { %205 = shalt.err (!%p202_p9)
}
  0x3d   :  { %128 = dma.vmem_to_hbm [thread:$0]  %s123_s2, 1024, %s285_s3, [#allocation4], %s213_s22, %s213_s22, %s214_s23  }
  0x3e   :  { %210 = dma.done.wait [#allocation4], 1024  }
  0x3f   :  { %211 = vsyncadd [#allocation4], 4294966272 }
  0x40   :  { %132 = vsyncpa [#allocation3], 1 }
  0x41   :  { %133 = vsyncpa [#allocation6], 1 }
  0x42   :  { %134 = vsyncpa [#allocation4], 1 }

</bundles_post_ra>
